<compile_context>
chip_gen: v7x
topology: tpu7x:2x2x1
jax: 0.10.0
libtpu: 0.0.40
codegen_flags: <defaults>
</compile_context>

<pallas_src>
import functools

import jax
import jax.numpy as jnp
from jax.experimental import pallas as pl
from jax.experimental.pallas import tpu as pltpu


def _round_up(x: int, m: int) -> int:
    return ((x + m - 1) // m) * m


def _cdiv(a: int, b: int) -> int:
    return -(-a // b)


_MAX_TILE_N = 512            # batch rows per tile (multiple of 8 sublanes)
_MAX_TILE_K = 2048           # feature-chunk size (multiple of 128 when chunked)
_RESIDENT_C_BYTES = 8 << 20  # keep prototypes VMEM-resident up to this raw size


def _plan(n, d, p, itemsize):
    """Tile sizing: minimize padding, amortize per-step overhead, fit v7x VMEM."""
    # --- batch (N) tiling: near-equal tiles, >=2 tiles for megacore when large --
    num_n = max(1, _cdiv(n, _MAX_TILE_N))
    if n >= 256 and num_n < 2:
        num_n = 2
    tile_n = _round_up(_cdiv(n, num_n), 8)
    n_pad = tile_n * num_n

    # --- feature (D) tiling: full D when it fits, else near-equal 128-multiples -
    if d <= _MAX_TILE_K:
        tile_k, d_pad, num_k = d, d, 1
    else:
        num_k = _cdiv(d, _MAX_TILE_K)
        tile_k = _round_up(_cdiv(d, num_k), 128)
        d_pad = tile_k * num_k

    # prototype dim padded to lane width -> lane-dense MXU result / output tiles
    p_pad = _round_up(max(p, 1), 128)

    resident = (p_pad * d_pad * itemsize) <= _RESIDENT_C_BYTES
    return tile_n, n_pad, num_n, tile_k, d_pad, num_k, p_pad, resident


def _dist_kernel(x_ref, c_ref, c2_ref, o_ref, *, tile_k, slice_k):
    """Accumulate ||x||^2 + ||c||^2 - 2 x.c over D chunks directly into o_ref.

    x_ref  : (tile_n, tile_k)          data chunk (caller dtype)
    c_ref  : (p_pad, d_pad|tile_k)     prototypes pre-scaled by -2 (VMEM resident)
    c2_ref : (1, p_pad)  f32           precomputed ||c||^2 (lane-major)
    o_ref  : (tile_n, p_pad) f32       output block, resident across the k axis
    """
    k = pl.program_id(1)

    @pl.when(k == 0)
    def _():
        o_ref[...] = jnp.broadcast_to(c2_ref[...], o_ref.shape)

    x = x_ref[...]
    if slice_k:
        start = pl.multiple_of(k * tile_k, tile_k)
        c = c_ref[:, pl.ds(start, tile_k)]
    else:
        c = c_ref[...]

    xf = x.astype(jnp.float32)
    x2 = jnp.sum(xf * xf, axis=-1, keepdims=True)              # (tile_n, 1) f32
    xc = jax.lax.dot_general(                                  # (tile_n, p_pad) = -2 x.c
        x, c,
        dimension_numbers=(((1,), (1,)), ((), ())),
        preferred_element_type=jnp.float32,
    )
    o_ref[...] += x2 + xc


def _argmin_kernel(x_ref, c_ref, c2_ref, o_ref, acc_ref, *, tile_k, slice_k):
    """Fused winner-takes-all: argmin over prototypes, emitting (tile_n, 1) int32.

    ||x||^2 is a per-row constant and is dropped; padded prototype columns are
    masked by +inf entries in c2, so they can never win the argmin.
    """
    k = pl.program_id(1)

    @pl.when(k == 0)
    def _():
        acc_ref[...] = jnp.broadcast_to(c2_ref[...], acc_ref.shape)

    x = x_ref[...]
    if slice_k:
        start = pl.multiple_of(k * tile_k, tile_k)
        c = c_ref[:, pl.ds(start, tile_k)]
    else:
        c = c_ref[...]

    xc = jax.lax.dot_general(
        x, c,
        dimension_numbers=(((1,), (1,)), ((), ())),
        preferred_element_type=jnp.float32,
    )
    acc_ref[...] += xc

    @pl.when(k == pl.num_programs(1) - 1)
    def _():
        dist = acc_ref[...]
        m = jnp.min(dist, axis=-1, keepdims=True)
        idx = jax.lax.broadcasted_iota(jnp.int32, dist.shape, 1)
        arg = jnp.min(
            jnp.where(dist <= m, idx, jnp.iinfo(jnp.int32).max),
            axis=-1, keepdims=True,
        )
        o_ref[...] = arg


def _pairwise_pallas(data, components, *, fused_argmin):
    n, d = data.shape
    p, d2 = components.shape
    assert d == d2
    itemsize = jnp.dtype(data.dtype).itemsize

    tile_n, n_pad, num_n, tile_k, d_pad, num_k, p_pad, resident = _plan(
        n, d, p, itemsize)
    slice_k = resident and num_k > 1

    # ---- host-side (XLA) prep: tiny prototype matrix only ---------------------
    comp = components.astype(data.dtype)
    c2 = jnp.sum(comp.astype(jnp.float32) ** 2, axis=-1)                    # (p,)
    pad_val = jnp.inf if fused_argmin else 0.0        # mask padded cols for argmin
    c2 = jnp.pad(c2, (0, p_pad - p), constant_values=pad_val)[None, :]      # (1,p_pad)

    c = -2.0 * comp                       # fold the -2 once (tiny, resident matrix)
    if (p_pad - p) or (d_pad - d):
        c = jnp.pad(c, ((0, p_pad - p), (0, d_pad - d)))

    x = data
    if (n_pad - n) or (d_pad - d):        # only copy when alignment actually needs it
        x = jnp.pad(x, ((0, n_pad - n), (0, d_pad - d)))

    if resident:
        c_spec = pl.BlockSpec((p_pad, d_pad), lambda i, k: (0, 0))
        c_stream_bytes = p_pad * d_pad * itemsize
    else:
        c_spec = pl.BlockSpec((p_pad, tile_k), lambda i, k: (0, k))
        c_stream_bytes = num_n * p_pad * d_pad * itemsize

    if fused_argmin:
        kernel = functools.partial(_argmin_kernel, tile_k=tile_k, slice_k=slice_k)
        out_shape = jax.ShapeDtypeStruct((n_pad, 1), jnp.int32)
        out_spec = pl.BlockSpec((tile_n, 1), lambda i, k: (i, 0))
        scratch = [pltpu.VMEM((tile_n, p_pad), jnp.float32)]
        out_bytes = n_pad * 4
    else:
        kernel = functools.partial(_dist_kernel, tile_k=tile_k, slice_k=slice_k)
        out_shape = jax.ShapeDtypeStruct((n_pad, p_pad), jnp.float32)
        out_spec = pl.BlockSpec((tile_n, p_pad), lambda i, k: (i, 0))
        scratch = []
        out_bytes = n_pad * p_pad * 4

    # ---- generation-aware VMEM budget (v7x: 64 MiB per TensorCore) ------------
    c_vmem = 2 * (p_pad * d_pad if resident else p_pad * tile_k) * itemsize
    vmem_need = (
        2 * tile_n * tile_k * itemsize      # data tiles (double buffered)
        + c_vmem                            # prototypes
        + 2 * tile_n * p_pad * 4            # output tiles
        + tile_n * p_pad * 4                # accumulator scratch (argmin path)
        + 2 * p_pad * 4                     # ||c||^2 row
    )
    try:
        vmem_cap = int(pltpu.get_tpu_info().vmem_capacity_bytes)
    except Exception:
        vmem_cap = 64 << 20                 # conservative: v7x per-TC budget
    vmem_limit = min(max(vmem_need + vmem_need // 4, 32 << 20),
                     vmem_cap - (8 << 20))
    vmem_limit = int(max(vmem_limit, vmem_need + (2 << 20)))

    cost = pl.CostEstimate(
        flops=2 * n_pad * p_pad * d_pad + 2 * n_pad * d_pad + n_pad * p_pad * num_k,
        transcendentals=0,
        bytes_accessed=n_pad * d_pad * itemsize + c_stream_bytes + out_bytes
        + p_pad * 4,
    )

    out = pl.pallas_call(
        kernel,
        out_shape=out_shape,
        grid_spec=pltpu.PrefetchScalarGridSpec(
            num_scalar_prefetch=0,
            grid=(num_n, num_k),            # reduction (D-chunk) axis last
            in_specs=[
                pl.BlockSpec((tile_n, tile_k), lambda i, k: (i, k)),  # data
                c_spec,                                               # -2 * components
                pl.BlockSpec((1, p_pad), lambda i, k: (0, 0)),        # ||c||^2
            ],
            out_specs=out_spec,
            scratch_shapes=scratch,
        ),
        compiler_params=pltpu.CompilerParams(
            dimension_semantics=("parallel", "arbitrary"),
            vmem_limit_bytes=vmem_limit,
        ),
        cost_estimate=cost,
    )(x, c, c2)
    return out


def squared_euclidean_distance(data, components):
    """Pairwise squared euclidean distance (N, P) via the tiled Pallas kernel."""
    n, p = data.shape[0], components.shape[0]
    out = _pairwise_pallas(data, components, fused_argmin=False)
    # Padded prototype columns hold ||x||^2 and padded rows are junk: slice both
    # off so the returned (N, P) matrix matches the PyTorch module exactly.
    return out[:n, :p]


def nearest_prototype(data, components):
    """Fused WTAC: index of the closest prototype per row, (N,) int32."""
    n = data.shape[0]
    idx = _pairwise_pallas(data, components, fused_argmin=True)
    return idx[:n, 0]


class GLVQ:
    """JAX/Pallas port of the GLVQ module (forward / predict only)."""

    def __init__(self, data, labels, distribution=(5, 5), noise=0.1, key=None):
        # LabeledComponents + SMCI initializer: prototypes are stratified class
        # means of `data` plus small noise; labels follow `distribution`.
        if key is None:
            key = jax.random.PRNGKey(0)
        comps, comp_labels = [], []
        for cls, count in enumerate(distribution):
            cls_mask = (labels == cls)[:, None].astype(data.dtype)
            cls_mean = jnp.sum(data * cls_mask, axis=0) / jnp.maximum(
                jnp.sum(cls_mask), 1.0)
            key, sub = jax.random.split(key)
            jitter = noise * jax.random.normal(sub, (count, data.shape[1]), data.dtype)
            comps.append(cls_mean[None, :] + jitter)
            comp_labels.append(jnp.full((count,), cls, dtype=jnp.int32))
        self.components = jnp.concatenate(comps, axis=0)       # (P, D)
        self.component_labels = jnp.concatenate(comp_labels)   # (P,)

    def forward(self, data):
        distance = squared_euclidean_distance(data, self.components)
        return distance, self.component_labels

    def predict(self, data):
        # Fused kernel: never materializes the padded (N, 128) distance matrix.
        idx = nearest_prototype(data, self.components)
        return self.component_labels[idx]


if __name__ == "__main__":
    key = jax.random.PRNGKey(0)
    k_data, k_lab, k_init, k_d2, k_c2 = jax.random.split(key, 5)

    N, D = 16, 32  # small synthetic dataset: 16 samples, 32 features
    data = jax.random.normal(k_data, (N, D), jnp.float32)
    labels = jax.random.randint(k_lab, (N,), 0, 2)

    model = GLVQ(data, labels, distribution=(5, 5), noise=0.1, key=k_init)

    # --- forward: distances against the plain-JAX reference --------------------
    distance, comp_labels = model.forward(data)
    distance = jax.block_until_ready(distance)
    ref = jnp.sum((data[:, None, :] - model.components[None, :, :]) ** 2, axis=-1)
    assert distance.shape == (N, 10)
    assert comp_labels.shape == (10,)
    assert jnp.allclose(distance, ref, atol=1e-3, rtol=1e-4)

    # --- fused predict: chosen prototype must attain the true minimum ----------
    idx = jax.block_until_ready(nearest_prototype(data, model.components))
    chosen = ref[jnp.arange(N), idx]
    assert jnp.allclose(chosen, jnp.min(ref, axis=-1), atol=1e-3, rtol=1e-4)
    preds = jax.block_until_ready(model.predict(data))
    assert preds.shape == (N,)
    assert jnp.array_equal(preds, model.component_labels[idx])

    # --- extra check: shapes that exercise the padding path (N%8!=0) -----------
    data2 = jax.random.normal(k_d2, (20, 40), jnp.float32)
    comps2 = jax.random.normal(k_c2, (10, 40), jnp.float32)
    d2 = jax.block_until_ready(squared_euclidean_distance(data2, comps2))
    ref2 = jnp.sum((data2[:, None, :] - comps2[None, :, :]) ** 2, axis=-1)
    assert jnp.allclose(d2, ref2, atol=1e-3, rtol=1e-4)

    print("KERNEL_OK")
</pallas_src>

<mosaic_0001>
module attributes {stable_mosaic.version = 11 : i64} {
  func.func @_dist_kernel(%arg0: i32, %arg1: i32, %arg2: memref<16x32xf32, #tpu.memory_space<vmem>>, %arg3: memref<128x32xf32, #tpu.memory_space<vmem>>, %arg4: memref<1x128xf32, #tpu.memory_space<vmem>>, %arg5: memref<16x128xf32, #tpu.memory_space<vmem>>) attributes {dimension_semantics = [#tpu.dimension_semantics<parallel>, #tpu.dimension_semantics<arbitrary>], iteration_bounds = array<i64: 1, 1>, scalar_prefetch = 0 : i64, scratch_operands = 0 : i64, tpu.core_type = #tpu.core_type<tc>, window_params = [{transform_indices = @transform_0, window_bounds = array<i64: 16, 32>}, {pipeline_mode = #tpu.pipeline_mode<synchronous>, transform_indices = @transform_1, window_bounds = array<i64: 128, 32>}, {pipeline_mode = #tpu.pipeline_mode<synchronous>, transform_indices = @transform_2, window_bounds = array<i64: 1, 128>}, {transform_indices = @transform_3, window_bounds = array<i64: 16, 128>}]} {
    %c0_i32 = arith.constant 0 : i32
    %0 = arith.cmpi eq, %arg1, %c0_i32 : i32
    %1 = arith.extui %0 : i1 to i32
    %c0_i32_0 = arith.constant 0 : i32
    %2 = arith.cmpi ne, %1, %c0_i32_0 : i32
    scf.if %2 {
      %c0_9 = arith.constant 0 : index
      %c0_10 = arith.constant 0 : index
      %14 = vector.load %arg4[%c0_9, %c0_10] : memref<1x128xf32, #tpu.memory_space<vmem>>, vector<1x128xf32>
      %15 = vector.shape_cast %14 : vector<1x128xf32> to vector<1x128xf32>
      %16 = vector.broadcast %15 : vector<1x128xf32> to vector<16x128xf32>
      %c0_11 = arith.constant 0 : index
      %c0_12 = arith.constant 0 : index
      %17 = vector.load %arg5[%c0_11, %c0_12] : memref<16x128xf32, #tpu.memory_space<vmem>>, vector<16x128xf32>
      tpu.vector_store %arg5[%c0_11, %c0_12], %16 {strides = array<i32>} : memref<16x128xf32, #tpu.memory_space<vmem>>, vector<16x128xf32>,
    } else {
    }
    %c0 = arith.constant 0 : index
    %c0_1 = arith.constant 0 : index
    %3 = vector.load %arg2[%c0, %c0_1] : memref<16x32xf32, #tpu.memory_space<vmem>>, vector<16x32xf32>
    %c0_2 = arith.constant 0 : index
    %c0_3 = arith.constant 0 : index
    %4 = vector.load %arg3[%c0_2, %c0_3] : memref<128x32xf32, #tpu.memory_space<vmem>>, vector<128x32xf32>
    %5 = arith.mulf %3, %3 : vector<16x32xf32>
    %cst = arith.constant dense<0.000000e+00> : vector<16xf32>
    %6 = vector.multi_reduction <add>, %5, %cst [1] : vector<16x32xf32> to vector<16xf32>
    %7 = vector.shape_cast %6 : vector<16xf32> to vector<16x1xf32>
    %cst_4 = arith.constant dense<0.000000e+00> : vector<16x128xf32>
    %8 = tpu.matmul %3, %4, %cst_4 {dimension_numbers = #tpu.dot_dimension_numbers<[1], [1], [0], [0], [0, 0, 1, 0], [], []>} : vector<16x32xf32>, vector<128x32xf32>, vector<16x128xf32> -> vector<16x128xf32>
    %c0_5 = arith.constant 0 : index
    %c0_6 = arith.constant 0 : index
    %9 = vector.load %arg5[%c0_5, %c0_6] : memref<16x128xf32, #tpu.memory_space<vmem>>, vector<16x128xf32>
    %10 = vector.broadcast %7 : vector<16x1xf32> to vector<16x128xf32>
    %11 = arith.addf %10, %8 : vector<16x128xf32>
    %12 = arith.addf %9, %11 : vector<16x128xf32>
    %c0_7 = arith.constant 0 : index
    %c0_8 = arith.constant 0 : index
    %13 = vector.load %arg5[%c0_7, %c0_8] : memref<16x128xf32, #tpu.memory_space<vmem>>, vector<16x128xf32>
    tpu.vector_store %arg5[%c0_7, %c0_8], %12 {strides = array<i32>} : memref<16x128xf32, #tpu.memory_space<vmem>>, vector<16x128xf32>,
    return
  }
  func.func @transform_0(%arg0: i32, %arg1: i32) -> (i32, i32) {
    %c0_i32 = arith.constant 0 : i32
    return %arg0, %arg1 : i32, i32
  }
  func.func @transform_1(%arg0: i32, %arg1: i32) -> (i32, i32) {
    %c0_i32 = arith.constant 0 : i32
    %c0_i32_0 = arith.constant 0 : i32
    %c0_i32_1 = arith.constant 0 : i32
    return %c0_i32, %c0_i32_0 : i32, i32
  }
  func.func @transform_2(%arg0: i32, %arg1: i32) -> (i32, i32) {
    %c0_i32 = arith.constant 0 : i32
    %c0_i32_0 = arith.constant 0 : i32
    %c0_i32_1 = arith.constant 0 : i32
    return %c0_i32, %c0_i32_0 : i32, i32
  }
  func.func @transform_3(%arg0: i32, %arg1: i32) -> (i32, i32) {
    %c0_i32 = arith.constant 0 : i32
    %c0_i32_0 = arith.constant 0 : i32
    return %arg0, %c0_i32 : i32, i32
  }
}

</mosaic_0001>

<bundles_post_ra>
// kernel: tpu_custom_call.1
= control target key start
LH: loop header
LB: loop body
LE: loop exit
PB: predicated region body
PF: predicated region fallthrough
CT: control target
= control target key end

     0   :  { %vm48_vm0 = vcmask 261120   ;;  %s489_s0 = inlined_call_operand.vmem [shape: f32[16,32], index: 0, kind: input, shape index: {}]   ;;  %s490_s1 = inlined_call_operand.vmem [shape: f32[128,32], index: 1, kind: input, shape index: {}]   ;;  %s491_s2 = inlined_call_operand.vmem [shape: f32[1,128], index: 2, kind: input, shape index: {}]   ;;  %s492_s3 = inlined_call_operand.hbm [shape: f32[16,128], index: 3, kind: output, shape index: {}]  }
   0x1   :  { %v30_v0 = vld [vmem:[%s490_s1] sm:$0xff]  ;;  %v31_v1 = vld [vmem:[%s490_s1 + $0x8] sm:$0xff]  ;;  %v32_v2 = vld [vmem:[%s490_s1 + $0x10] sm:$0xff] }
   0x2   :  { %v280_v3 = vpack.c.bf16 %v31_v1, %v30_v0  ;;  %vm389_vm1 = vmpackc.low %vm48_vm0, %vm48_vm0  ;;  %v33_v5 = vld [vmem:[%s490_s1 + $0x18] sm:$0xff]  ;;  %v34_v7 = vld [vmem:[%s490_s1 + $0x20] sm:$0xff] }
   0x3   :  { %v286_v6 = vpack.c.bf16 %v33_v5, %v32_v2  ;;  %v28_v8 = vld [vmem:[%s489_s0] sm:$0xff]  ;;  %v35_v9 = vld [vmem:[%s490_s1 + $0x28] sm:$0xff] }
   0x4   :  { %282 = vmatprep.subr.msk.bf16.mxu0 %vm389_vm1, %v280_v3  ;;  %v46_v10 = vmul.f32 %v28_v8, %v28_v8  ;;  %277 = vmatprep.mubr.msk.f32.mxu0 %vm48_vm0, %v28_v8  ;;  %v29_v11 = vld [vmem:[%s489_s0 + $0x8] sm:$0xff] }
   0x5   :  { %285 = vmatpush3.bf16.xpose.msk.msra.mxu0 %vm389_vm1, %v280_v3 }
   0x6   :  { %288 = vmatprep.subr.msk.bf16.mxu0 %vm389_vm1, %v286_v6 }
   0x7   :  { %8 = vsyncpa [#allocation3], 0  ;;  %v47_v12 = vmul.f32 %v29_v11, %v29_v11  ;;  %v49_v13 = vsel %vm48_vm0, %v46_v10, 0.0  ;;  %v292_v14 = vpack.c.bf16 %v35_v9, %v34_v7  ;;  %v36_v16 = vld [vmem:[%s490_s1 + $0x30] sm:$0xff]  ;;  %v37_v17 = vld [vmem:[%s490_s1 + $0x38] sm:$0xff] }
   0x8   :  { %50 = vadd.xlane.f32.xlu0 %v49_v13  ;;  %v298_v18 = vpack.c.bf16 %v37_v17, %v36_v16  ;;  %v38_v19 = vld [vmem:[%s490_s1 + $0x40] sm:$0xff]  ;;  %v39_v20 = vld [vmem:[%s490_s1 + $0x48] sm:$0xff]  ;;  %v40_v22 = vld [vmem:[%s490_s1 + $0x50] sm:$0xff] }
   0x9   :  { %v52_v15 = vsel %vm48_vm0, %v47_v12, 0.0  ;;  %v304_v21 = vpack.c.bf16 %v39_v20, %v38_v19  ;;  %v41_v23 = vld [vmem:[%s490_s1 + $0x58] sm:$0xff]  ;;  %v42_v25 = vld [vmem:[%s490_s1 + $0x60] sm:$0xff]  ;;  %v43_v26 = vld [vmem:[%s490_s1 + $0x68] sm:$0xff] }
   0xa   :  { %v310_v24 = vpack.c.bf16 %v41_v23, %v40_v22  ;;  %v316_v27 = vpack.c.bf16 %v43_v26, %v42_v25  ;;  %v44_v28 = vld [vmem:[%s490_s1 + $0x70] sm:$0xff]  ;;  %v45_v29 = vld [vmem:[%s490_s1 + $0x78] sm:$0xff]  ;;  %v208_v34 = vld [vmem:[%s491_s2] ss:$0 sm:$0xff]  ;;  %s355_s1 = smov [#allocation2]  }
   0xb   :  { %v322_v30 = vpack.c.bf16 %v45_v29, %v44_v28  ;;  %s197_s22 = sshll.u32 %s355_s1, 4  ;;  %s198_s22 = int_to_ptr.vmem [resolvable:$true] %s197_s22 }
   0xc   :  { %53 = vadd.xlane.f32.xlu0 %v52_v15  ;;  %s331_s23 = scalar_lea.vmem %s198_s22, 256  ;;  %p336_p1 = scmp.lt.s32.totalorder %s198_s22, %s198_s22 }
   0xd   :  { %291 = vmatpush3.bf16.xpose.msk.msra.mxu0 %vm389_vm1, %v286_v6  ;;  %p332_p0 = scmp.ne.s32.totalorder %s198_s22, %s331_s23  ;;  %p337_p2 = scmp.lt.s32.totalorder %s331_s23, %s331_s23 }
   0xe   :  { %294 = vmatprep.subr.msk.bf16.mxu0 %vm389_vm1, %v292_v14 }
   0xf   :  { %p338_p3 = por %p337_p2, %p336_p1 }
  0x11   :  { %p339_p4 = pnand %p338_p3, %p332_p0 }
  0x15   :  { %297 = vmatpush3.bf16.xpose.msk.msra.mxu0 %vm389_vm1, %v292_v14 }
  0x16   :  { %300 = vmatprep.subr.msk.bf16.mxu0 %vm389_vm1, %v298_v18 }
  0x1d   :  { %303 = vmatpush3.bf16.xpose.msk.msra.mxu0 %vm389_vm1, %v298_v18 }
  0x1e   :  { %306 = vmatprep.subr.msk.bf16.mxu0 %vm389_vm1, %v304_v21 }
  0x25   :  { %309 = vmatpush3.bf16.xpose.msk.msra.mxu0 %vm389_vm1, %v304_v21 }
  0x26   :  { %312 = vmatprep.subr.msk.bf16.mxu0 %vm389_vm1, %v310_v24 }
  0x2d   :  { %315 = vmatpush3.bf16.xpose.msk.msra.mxu0 %vm389_vm1, %v310_v24 }
  0x2e   :  { %318 = vmatprep.subr.msk.bf16.mxu0 %vm389_vm1, %v316_v27 }
  0x35   :  { %321 = vmatpush3.bf16.xpose.msk.msra.mxu0 %vm389_vm1, %v316_v27 }
  0x36   :  { %324 = vmatprep.subr.msk.bf16.mxu0 %vm389_vm1, %v322_v30 }
  0x3d   :  { %327 = vmatpush3.bf16.xpose.msk.msra.mxu0 %vm389_vm1, %v322_v30 }
  0x44   :  { %278 = vmatmul.mubr.msk.f32.vlgmr.msra.gmra.mrb[0].mxu0 %vm48_vm0, %v29_v11 }
  0x95   :  { %v51_v31 = vpop.xlane.xlu0 %50 }
  0x99   :  { %v54_v32 = vpop.xlane.xlu0 %53 }
 0x117   :  { %v279_v33 = vpop.f32.mrb[0].mxu0 }
 0x118   :  { %v187_v35 = vadd.f32 %v279_v33, %v54_v32  ;;  %v175_v36 = vpop.f32.mrb[1].mxu0 }
 0x119   :  { %v186_v37 = vadd.f32 %v175_v36, %v51_v31 }
 0x11a   :  { %v189_v38 = vadd.f32 %v208_v34, %v187_v35 }
 0x11b   :  { %v188_v39 = vadd.f32 %v208_v34, %v186_v37 }
 0x11c   :  { %191 = vst [vmem:[#allocation2 + $0x8] sm:$0xff] %v189_v38 }
 0x11d   :  { %190 = vst [vmem:[#allocation2] sm:$0xff] %v188_v39 }
 0x11e   :  { %342 = shalt.err (!%p339_p4)
}
 0x11f   :  { %s343_s2 = scalar_lea.hbm %s492_s3, 256 }
 0x120   :  { %p344_p5 = scmp.ne.s32.totalorder %s492_s3, %s343_s2  ;;  %p347_p6 = scmp.lt.u32.totalorder %s343_s2, %s492_s3 }
 0x122   :  { %p349_p7 = pnand %p347_p6, %p344_p5 }
 0x124   :  { %352 = shalt.err (!%p349_p7)
}
 0x125   :  { %s356_s0 = smov 128   ;;  %s357_s30 = smov 8  }
 0x126   :  { %203 = dma.vmem_to_hbm [thread:$0]  %s198_s22, 256, %s492_s3, [#allocation3], %s356_s0, %s356_s0, %s357_s30  }
 0x127   :  { %353 = dma.done.wait [#allocation3], 256  }
 0x128   :  { %354 = vsyncadd [#allocation3], 4294967040 }
 0x129   :  { %207 = vsyncpa [#allocation3], 1 }

</bundles_post_ra>
